<compile_context>
chip_gen: v7x
topology: tpu7x:2x2x1
jax: 0.10.0
libtpu: 0.0.40
codegen_flags: <defaults>
</compile_context>

<pallas_src>
import jax
import jax.numpy as jnp
from jax.experimental import pallas as pl
from jax.experimental.pallas import tpu as pltpu


def _round_up(x, m):
    return ((x + m - 1) // m) * m


def head_kernel(f1_ref, f2_ref, w1a_ref, w1b_ref, vecs_ref, out_ref):
    # Fused concat: [f1 f2] @ W1 == f1 @ W1[:nhid] + f2 @ W1[nhid:]  (f32 accumulate).
    h = jnp.dot(f1_ref[...], w1a_ref[...], preferred_element_type=jnp.float32)
    h = h + jnp.dot(f2_ref[...], w1b_ref[...], preferred_element_type=jnp.float32)

    b1 = vecs_ref[0:1, :]      # (1, nhid)  bias of Linear(2*nhid -> nhid)
    alpha = vecs_ref[1:2, :]   # (1, nhid)  PReLU per-channel slopes
    wd = vecs_ref[2:3, :]      # (1, nhid)  w2[:, 1] - w2[:, 0]
    bd = vecs_ref[3:4, 0:1]    # (1, 1)     b2[1]    - b2[0]

    h = h + b1
    h = jnp.where(h >= 0.0, h, alpha * h)                    # PReLU(nhid)

    # Linear(nhid -> 2) + Softmax(dim=1)[:, 1]  ==  sigmoid(logit1 - logit0).
    ld = jnp.sum(h * wd, axis=-1, keepdims=True) + bd        # (TB, 1)
    out_ref[...] = pl.reciprocal(1.0 + jnp.exp(-ld), approx=True)


def _head_forward_ref(feature1, feature2, params):
    """Pure-JAX fast path (exact original module math, f32)."""
    w1, b1, alpha, w2, b2 = params
    x = jnp.concatenate([feature1, feature2], axis=-1)
    h = x @ w1 + b1.reshape(1, -1)
    h = jnp.where(h >= 0.0, h, alpha.reshape(1, -1) * h)
    logits = h @ w2 + b2.reshape(1, -1)
    return jax.nn.softmax(logits, axis=-1)[:, 1]


def _head_forward_pallas(feature1, feature2, params, compute_dtype=jnp.bfloat16):
    w1, b1, alpha, w2, b2 = params
    nhid = w1.shape[1]
    B = feature1.shape[0]

    # ---- Batch tiling: large tiles to amortize per-step overhead; an even number of
    # >=2 grid steps when the batch is big enough so v7x's 2 TensorCores both get work.
    MAX_TB = 4096
    SPLIT_THRESHOLD = 512
    if B <= SPLIT_THRESHOLD:
        n_tiles = 1
    else:
        n_tiles = max(2, -(-B // MAX_TB))
        if n_tiles % 2:
            n_tiles += 1
    TB = _round_up(-(-B // n_tiles), 16)          # multiple of 16 (bf16 sublane packing)
    B_pad = n_tiles * TB

    # ---- Trace-time operand repacking (tiny, done once per call).
    f1 = feature1.astype(compute_dtype)
    f2 = feature2.astype(compute_dtype)
    if B_pad != B:
        pad = ((0, B_pad - B), (0, 0))
        f1 = jnp.pad(f1, pad)
        f2 = jnp.pad(f2, pad)

    w1a = w1[:nhid, :].astype(compute_dtype)      # (nhid, nhid)  top half of W1
    w1b = w1[nhid:, :].astype(compute_dtype)      # (nhid, nhid)  bottom half of W1
    b2r = jnp.ravel(b2).astype(jnp.float32)
    vecs = jnp.stack(
        [
            jnp.ravel(b1).astype(jnp.float32),                    # row 0: b1
            jnp.ravel(alpha).astype(jnp.float32),                 # row 1: PReLU alpha
            (w2[:, 1] - w2[:, 0]).astype(jnp.float32),            # row 2: wd
            jnp.full((nhid,), b2r[1] - b2r[0], dtype=jnp.float32),  # row 3: bd (bcast)
        ],
        axis=0,
    )                                                             # (4, nhid) f32

    score = pl.pallas_call(
        head_kernel,
        out_shape=jax.ShapeDtypeStruct((B_pad, 1), jnp.float32),
        grid=(n_tiles,),
        in_specs=[
            pl.BlockSpec((TB, nhid), lambda i: (i, 0)),      # feature1 tile (bf16)
            pl.BlockSpec((TB, nhid), lambda i: (i, 0)),      # feature2 tile (bf16)
            pl.BlockSpec((nhid, nhid), lambda i: (0, 0)),    # W1 top half (resident)
            pl.BlockSpec((nhid, nhid), lambda i: (0, 0)),    # W1 bottom half (resident)
            pl.BlockSpec((4, nhid), lambda i: (0, 0)),       # merged b1/alpha/wd/bd
        ],
        out_specs=pl.BlockSpec((TB, 1), lambda i: (i, 0)),
        compiler_params=pltpu.CompilerParams(
            dimension_semantics=("parallel",)),
    )(f1, f2, w1a, w1b, vecs)

    return score[:B, 0]


def head_test_forward(feature1, feature2, params, no_list=False,
                      min_pallas_batch=1024, compute_dtype=jnp.bfloat16):
    """Pallas/JAX implementation of HEAD_test.forward (batched + single-vector paths)."""
    single = feature1.ndim == 1
    if single:
        feature1 = feature1[None, :]
        feature2 = feature2[None, :]
    B = feature1.shape[0]

    if B < min_pallas_batch:
        # Tiny batches / single vector: kernel-launch cost can never win; let XLA fuse.
        score = _head_forward_ref(feature1, feature2, params)
    else:
        score = _head_forward_pallas(feature1, feature2, params, compute_dtype)

    if single:
        # torch: is_same = False iff pred[0,0] > pred[0,1]  <=>  is_same = (score >= 0.5)
        return bool(score[0] >= 0.5)
    if no_list:
        return score
    # Python-list branch mirrors torch's .cpu().detach().numpy() host glue.
    return list(jax.device_get(score))


def init_params(key, nhid):
    """Deterministic parameter init matching nn.Linear / nn.PReLU shapes."""
    k1, k2, k3, k4 = jax.random.split(key, 4)
    in_dim = 2 * nhid
    lim1 = 1.0 / jnp.sqrt(in_dim)
    # Linear(nhid*2, nhid): stored transposed as (in, out).
    w1 = jax.random.uniform(k1, (in_dim, nhid), jnp.float32, -lim1, lim1)
    b1 = jax.random.uniform(k2, (1, nhid), jnp.float32, -lim1, lim1)
    # PReLU(nhid): per-channel slope, default init 0.25.
    alpha = jnp.full((1, nhid), 0.25, dtype=jnp.float32)
    # Linear(nhid, 2): stored transposed as (in, out).
    lim2 = 1.0 / jnp.sqrt(nhid)
    w2 = jax.random.uniform(k3, (nhid, 2), jnp.float32, -lim2, lim2)
    b2 = jax.random.uniform(k4, (1, 2), jnp.float32, -lim2, lim2)
    return (w1, b1, alpha, w2, b2)


if __name__ == "__main__":
    nhid = 32
    B = 8

    key = jax.random.PRNGKey(0)
    kp, kf1, kf2 = jax.random.split(key, 3)

    params = init_params(kp, nhid)
    feature1 = jax.random.normal(kf1, (B, nhid), dtype=jnp.float32)
    feature2 = jax.random.normal(kf2, (B, nhid), dtype=jnp.float32)

    # Batched path (no_list=True): force the Pallas kernel even at this tiny batch.
    score = head_test_forward(feature1, feature2, params, no_list=True,
                              min_pallas_batch=1)
    score = jax.block_until_ready(score)

    # Pure-JAX f32 reference of the original module math.
    w1, b1, alpha, w2, b2 = params
    x = jnp.concatenate([feature1, feature2], axis=1)
    h = x @ w1 + b1
    h = jnp.where(h >= 0.0, h, alpha * h)
    logits = h @ w2 + b2
    ref = jax.nn.softmax(logits, axis=1)[:, 1]

    assert score.shape == (B,)
    # bf16 inputs + approx reciprocal vs. the exact f32 reference -> loose-ish tolerance.
    assert jnp.allclose(score, ref, atol=2e-2), (score, ref)

    # Single-vector path: torch returns is_same = not(pred[0,0] > pred[0,1]).
    is_same = head_test_forward(feature1[0], feature2[0], params)
    assert is_same == bool(ref[0] >= 0.5)

    # Default list branch (no_list=False), through the Pallas path as well.
    lst = head_test_forward(feature1, feature2, params, no_list=False,
                            min_pallas_batch=1)
    assert isinstance(lst, list) and len(lst) == B

    print("KERNEL_OK")
</pallas_src>

<mosaic_0001>
module attributes {stable_mosaic.version = 11 : i64} {
  func.func @head_kernel(%arg0: i32, %arg1: memref<16x32xbf16, #tpu.memory_space<vmem>>, %arg2: memref<16x32xbf16, #tpu.memory_space<vmem>>, %arg3: memref<32x32xbf16, #tpu.memory_space<vmem>>, %arg4: memref<32x32xbf16, #tpu.memory_space<vmem>>, %arg5: memref<4x32xf32, #tpu.memory_space<vmem>>, %arg6: memref<16x1xf32, #tpu.memory_space<vmem>>) attributes {dimension_semantics = [#tpu.dimension_semantics<parallel>], iteration_bounds = array<i64: 1>, scalar_prefetch = 0 : i64, scratch_operands = 0 : i64, tpu.core_type = #tpu.core_type<tc>, window_params = [{transform_indices = @transform_0, window_bounds = array<i64: 16, 32>}, {transform_indices = @transform_1, window_bounds = array<i64: 16, 32>}, {pipeline_mode = #tpu.pipeline_mode<synchronous>, transform_indices = @transform_2, window_bounds = array<i64: 32, 32>}, {pipeline_mode = #tpu.pipeline_mode<synchronous>, transform_indices = @transform_3, window_bounds = array<i64: 32, 32>}, {pipeline_mode = #tpu.pipeline_mode<synchronous>, transform_indices = @transform_4, window_bounds = array<i64: 4, 32>}, {transform_indices = @transform_5, window_bounds = array<i64: 16, 1>}]} {
    %c0 = arith.constant 0 : index
    %c0_0 = arith.constant 0 : index
    %0 = vector.load %arg1[%c0, %c0_0] : memref<16x32xbf16, #tpu.memory_space<vmem>>, vector<16x32xbf16>
    %c0_1 = arith.constant 0 : index
    %c0_2 = arith.constant 0 : index
    %1 = vector.load %arg3[%c0_1, %c0_2] : memref<32x32xbf16, #tpu.memory_space<vmem>>, vector<32x32xbf16>
    %cst = arith.constant dense<0.000000e+00> : vector<16x32xf32>
    %2 = tpu.matmul %0, %1, %cst {dimension_numbers = #tpu.dot_dimension_numbers<[1], [0], [0], [1], [0, 0, 1, 1], [], []>} : vector<16x32xbf16>, vector<32x32xbf16>, vector<16x32xf32> -> vector<16x32xf32>
    %c0_3 = arith.constant 0 : index
    %c0_4 = arith.constant 0 : index
    %3 = vector.load %arg2[%c0_3, %c0_4] : memref<16x32xbf16, #tpu.memory_space<vmem>>, vector<16x32xbf16>
    %c0_5 = arith.constant 0 : index
    %c0_6 = arith.constant 0 : index
    %4 = vector.load %arg4[%c0_5, %c0_6] : memref<32x32xbf16, #tpu.memory_space<vmem>>, vector<32x32xbf16>
    %cst_7 = arith.constant dense<0.000000e+00> : vector<16x32xf32>
    %5 = tpu.matmul %3, %4, %cst_7 {dimension_numbers = #tpu.dot_dimension_numbers<[1], [0], [0], [1], [0, 0, 1, 1], [], []>} : vector<16x32xbf16>, vector<32x32xbf16>, vector<16x32xf32> -> vector<16x32xf32>
    %6 = arith.addf %2, %5 : vector<16x32xf32>
    %c0_8 = arith.constant 0 : index
    %c0_9 = arith.constant 0 : index
    %7 = vector.load %arg5[%c0_8, %c0_9] : memref<4x32xf32, #tpu.memory_space<vmem>>, vector<1x32xf32>
    %c1 = arith.constant 1 : index
    %c0_10 = arith.constant 0 : index
    %8 = vector.load %arg5[%c1, %c0_10] : memref<4x32xf32, #tpu.memory_space<vmem>>, vector<1x32xf32>
    %c2 = arith.constant 2 : index
    %c0_11 = arith.constant 0 : index
    %9 = vector.load %arg5[%c2, %c0_11] : memref<4x32xf32, #tpu.memory_space<vmem>>, vector<1x32xf32>
    %c3 = arith.constant 3 : index
    %c0_12 = arith.constant 0 : index
    %10 = vector.load %arg5[%c3, %c0_12] : memref<4x32xf32, #tpu.memory_space<vmem>>, vector<1x1xf32>
    %11 = vector.broadcast %7 : vector<1x32xf32> to vector<16x32xf32>
    %12 = arith.addf %6, %11 : vector<16x32xf32>
    %cst_13 = arith.constant 0.000000e+00 : f32
    %13 = vector.broadcast %cst_13 : f32 to vector<16x32xf32>
    %14 = arith.cmpf oge, %12, %13 : vector<16x32xf32>
    %15 = vector.broadcast %8 : vector<1x32xf32> to vector<16x32xf32>
    %16 = arith.mulf %15, %12 : vector<16x32xf32>
    %17 = arith.select %14, %12, %16 : vector<16x32xi1>, vector<16x32xf32>
    %18 = vector.broadcast %9 : vector<1x32xf32> to vector<16x32xf32>
    %19 = arith.mulf %17, %18 : vector<16x32xf32>
    %cst_14 = arith.constant dense<0.000000e+00> : vector<16xf32>
    %20 = vector.multi_reduction <add>, %19, %cst_14 [1] : vector<16x32xf32> to vector<16xf32>
    %21 = vector.shape_cast %20 : vector<16xf32> to vector<16x1xf32>
    %22 = vector.broadcast %10 : vector<1x1xf32> to vector<16x1xf32>
    %23 = arith.addf %21, %22 : vector<16x1xf32>
    %cst_15 = arith.constant 0.000000e+00 : f32
    %24 = vector.broadcast %cst_15 : f32 to vector<16x1xf32>
    %25 = arith.subf %24, %23 : vector<16x1xf32>
    %26 = math.exp %25 : vector<16x1xf32>
    %cst_16 = arith.constant 1.000000e+00 : f32
    %27 = vector.broadcast %cst_16 : f32 to vector<16x1xf32>
    %28 = arith.addf %27, %26 : vector<16x1xf32>
    %29 = tpu.reciprocal %28 {approx = true} : vector<16x1xf32> -> vector<16x1xf32>
    %c0_17 = arith.constant 0 : index
    %c0_18 = arith.constant 0 : index
    %30 = vector.load %arg6[%c0_17, %c0_18] : memref<16x1xf32, #tpu.memory_space<vmem>>, vector<16x1xf32>
    tpu.vector_store %arg6[%c0_17, %c0_18], %29 {strides = array<i32>} : memref<16x1xf32, #tpu.memory_space<vmem>>, vector<16x1xf32>,
    return
  }
  func.func @transform_0(%arg0: i32) -> (i32, i32) {
    %c0_i32 = arith.constant 0 : i32
    %c0_i32_0 = arith.constant 0 : i32
    return %arg0, %c0_i32 : i32, i32
  }
  func.func @transform_1(%arg0: i32) -> (i32, i32) {
    %c0_i32 = arith.constant 0 : i32
    %c0_i32_0 = arith.constant 0 : i32
    return %arg0, %c0_i32 : i32, i32
  }
  func.func @transform_2(%arg0: i32) -> (i32, i32) {
    %c0_i32 = arith.constant 0 : i32
    %c0_i32_0 = arith.constant 0 : i32
    %c0_i32_1 = arith.constant 0 : i32
    return %c0_i32, %c0_i32_0 : i32, i32
  }
  func.func @transform_3(%arg0: i32) -> (i32, i32) {
    %c0_i32 = arith.constant 0 : i32
    %c0_i32_0 = arith.constant 0 : i32
    %c0_i32_1 = arith.constant 0 : i32
    return %c0_i32, %c0_i32_0 : i32, i32
  }
  func.func @transform_4(%arg0: i32) -> (i32, i32) {
    %c0_i32 = arith.constant 0 : i32
    %c0_i32_0 = arith.constant 0 : i32
    %c0_i32_1 = arith.constant 0 : i32
    return %c0_i32, %c0_i32_0 : i32, i32
  }
  func.func @transform_5(%arg0: i32) -> (i32, i32) {
    %c0_i32 = arith.constant 0 : i32
    %c0_i32_0 = arith.constant 0 : i32
    return %arg0, %c0_i32 : i32, i32
  }
}

</mosaic_0001>

<bundles_post_ra>
// kernel: tpu_custom_call.1
= control target key start
LH: loop header
LB: loop body
LE: loop exit
PB: predicated region body
PF: predicated region fallthrough
CT: control target
= control target key end

     0   :  { %10 = vsyncpa [#allocation3], 0  ;;  %s553_s0 = inlined_call_operand.hbm [shape: bf16[16,32], index: 0, kind: input, shape index: {}]   ;;  %s554_s1 = inlined_call_operand.hbm [shape: bf16[16,32], index: 1, kind: input, shape index: {}]   ;;  %s555_s2 = inlined_call_operand.hbm [shape: bf16[32,32], index: 2, kind: input, shape index: {}]   ;;  %s556_s3 = inlined_call_operand.hbm [shape: bf16[32,32], index: 3, kind: input, shape index: {}]   ;;  %s557_s4 = inlined_call_operand.vmem [shape: f32[4,32], index: 4, kind: input, shape index: {}]   ;;  %s558_s5 = inlined_call_operand.vmem [shape: f32[16,1], index: 5, kind: output, shape index: {}]  }
   0x1   :  { %11 = vsyncpa [#allocation5], 0 }
   0x2   :  { %12 = vsyncpa [#allocation8], 0  ;;  %s419_s18 = smov [#allocation4]   ;;  %s420_s20 = smov [#allocation2]  }
   0x3   :  { %s30_s19 = sshll.u32 %s419_s18, 4  ;;  %s18_s21 = sshll.u32 %s420_s20, 4  ;;  %s31_s19 = int_to_ptr.vmem [resolvable:$true] %s30_s19  ;;  %s457_s21 = int_to_ptr.vmem [resolvable:$true] %s18_s21 }
   0x4   :  { %s325_s24 = scalar_lea.hbm %s554_s1, 128 }
   0x5   :  { %p326_p0 = scmp.ne.s32.totalorder %s554_s1, %s325_s24  ;;  %p329_p1 = scmp.lt.u32.totalorder %s325_s24, %s554_s1 }
   0x7   :  { %p331_p2 = pnand %p329_p1, %p326_p0 }
   0x9   :  { %334 = shalt.err (!%p331_p2)
}
   0xa   :  { %s335_s29 = scalar_lea.vmem %s31_s19, 128  ;;  %p340_p4 = scmp.lt.s32.totalorder %s31_s19, %s31_s19 }
   0xb   :  { %p336_p3 = scmp.ne.s32.totalorder %s31_s19, %s335_s29  ;;  %p341_p5 = scmp.lt.s32.totalorder %s335_s29, %s335_s29 }
   0xd   :  { %p342_p6 = por %p341_p5, %p340_p4 }
   0xf   :  { %p343_p7 = pnand %p342_p6, %p336_p3 }
  0x11   :  { %346 = shalt.err (!%p343_p7)
}
  0x12   :  { %s421_s30 = smov 64   ;;  %s422_s6 = smov 4  }
  0x13   :  { %36 = dma.hbm_to_vmem [thread:$0]  %s554_s1, 128, %s31_s19, [#allocation5], %s421_s30, %s421_s30, %s422_s6  }
  0x14   :  { %s347_s11 = scalar_lea.hbm %s553_s0, 128 }
  0x15   :  { %p348_p8 = scmp.ne.s32.totalorder %s553_s0, %s347_s11  ;;  %p351_p9 = scmp.lt.u32.totalorder %s347_s11, %s553_s0 }
  0x17   :  { %p353_p10 = pnand %p351_p9, %p348_p8 }
  0x19   :  { %356 = shalt.err (!%p353_p10)
}
  0x1a   :  { %s357_s16 = scalar_lea.vmem %s457_s21, 128  ;;  %p362_p12 = scmp.lt.s32.totalorder %s457_s21, %s457_s21 }
  0x1b   :  { %p358_p11 = scmp.ne.s32.totalorder %s457_s21, %s357_s16  ;;  %p363_p13 = scmp.lt.s32.totalorder %s357_s16, %s357_s16 }
  0x1d   :  { %p364_p0 = por %p363_p13, %p362_p12 }
  0x1f   :  { %p365_p1 = pnand %p364_p0, %p358_p11 }
  0x21   :  { %368 = shalt.err (!%p365_p1)
}
  0x22   :  { %24 = dma.hbm_to_vmem [thread:$0]  %s553_s0, 128, %s457_s21, [#allocation3], %s421_s30, %s421_s30, %s422_s6  }
  0x23   :  { %s423_s18 = smov [#allocation6]   ;;  %s424_s20 = smov [#allocation7]  }
  0x24   :  { %s42_s19 = sshll.u32 %s423_s18, 4  ;;  %s54_s22 = sshll.u32 %s424_s20, 4  ;;  %s43_s19 = int_to_ptr.vmem [resolvable:$true] %s42_s19  ;;  %s494_s22 = int_to_ptr.vmem [resolvable:$true] %s54_s22 }
  0x25   :  { %s369_s25 = scalar_lea.hbm %s555_s2, 256 }
  0x26   :  { %p370_p2 = scmp.ne.s32.totalorder %s555_s2, %s369_s25  ;;  %p373_p3 = scmp.lt.u32.totalorder %s369_s25, %s555_s2 }
  0x28   :  { %p375_p4 = pnand %p373_p3, %p370_p2 }
  0x2a   :  { %378 = shalt.err (!%p375_p4)
}
  0x2b   :  { %s379_s0 = scalar_lea.vmem %s43_s19, 256  ;;  %p384_p6 = scmp.lt.s32.totalorder %s43_s19, %s43_s19 }
  0x2c   :  { %p380_p5 = scmp.ne.s32.totalorder %s43_s19, %s379_s0  ;;  %p385_p7 = scmp.lt.s32.totalorder %s379_s0, %s379_s0 }
  0x2e   :  { %p386_p8 = por %p385_p7, %p384_p6 }
  0x30   :  { %p387_p9 = pnand %p386_p8, %p380_p5 }
  0x32   :  { %390 = shalt.err (!%p387_p9)
}
  0x33   :  { %48 = dma.hbm_to_vmem [thread:$0]  %s555_s2, 256, %s43_s19, [#allocation5], %s421_s30, %s421_s30, %s422_s6  }
  0x34   :  { %s391_s10 = scalar_lea.hbm %s556_s3, 256 }
  0x35   :  { %p392_p10 = scmp.ne.s32.totalorder %s556_s3, %s391_s10  ;;  %p395_p11 = scmp.lt.u32.totalorder %s391_s10, %s556_s3 }
  0x37   :  { %p397_p12 = pnand %p395_p11, %p392_p10 }
  0x39   :  { %400 = shalt.err (!%p397_p12)
}
  0x3a   :  { %s401_s15 = scalar_lea.vmem %s494_s22, 256  ;;  %p406_p0 = scmp.lt.s32.totalorder %s494_s22, %s494_s22 }
  0x3b   :  { %p402_p13 = scmp.ne.s32.totalorder %s494_s22, %s401_s15  ;;  %p407_p1 = scmp.lt.s32.totalorder %s401_s15, %s401_s15 }
  0x3d   :  { %p408_p2 = por %p407_p1, %p406_p0 }
  0x3f   :  { %p409_p3 = pnand %p408_p2, %p402_p13 }
  0x41   :  { %412 = shalt.err (!%p409_p3)
}
  0x42   :  { %60 = dma.hbm_to_vmem [thread:$0]  %s556_s3, 256, %s494_s22, [#allocation8], %s421_s30, %s421_s30, %s422_s6  }
  0x43   :  { %413 = dma.done.wait [#allocation3], 128  }
  0x44   :  { %414 = vsyncadd [#allocation3], 4294967168 }
  0x45   :  { %415 = dma.done.wait [#allocation5], 384  }
  0x46   :  { %416 = vsyncadd [#allocation5], 4294966912 }
  0x47   :  { %417 = dma.done.wait [#allocation8], 256  }
  0x48   :  { %418 = vsyncadd [#allocation8], 4294967040  ;;  %v425_v0 = vmov 0.0   ;;  %vm426_vm0 = vmmov 0   ;;  %v311_v1 = vld [vmem:[#allocation7] sm:$0xff]   ;;  %v312_v2 = vld [vmem:[#allocation6] sm:$0xff]  }
  0x49   :  { %287 = vmatprep.subr.bf16.mxu0 %v425_v0  ;;  %295 = vmatprep.subr.bf16.mxu1 %v425_v0  ;;  %v313_v3 = vld [vmem:[#allocation7 + $0x8] sm:$0xff]   ;;  %v314_v4 = vld [vmem:[#allocation6 + $0x8] sm:$0xff]   ;;  %vm105_vm1 = vcmask 261120   ;;  %v316_v6 = vld [vmem:[#allocation2] sm:$0xff]   ;;  %vm259_vm4 = vcmask 7168  }
  0x4a   :  { %291 = vmatprep.mubr.msk.bf16.mxu0 %vm426_vm0, %v425_v0  ;;  %299 = vmatprep.mubr.msk.bf16.mxu1 %vm426_vm0, %v425_v0  ;;  %v315_v5 = vld [vmem:[#allocation4] sm:$0xff]   ;;  %v277_v9 = vld [vmem:[%s557_s4] ss:$0 sm:$0xff]  ;;  %v278_v14 = vld [vmem:[%s557_s4 + $0x1] ss:$0 sm:$0xff] }
  0x4b   :  { %288 = vmatpush3.bf16.msra.mxu0 %v311_v1  ;;  %296 = vmatpush3.bf16.msra.mxu1 %v312_v2  ;;  %v279_v22 = vld [vmem:[%s557_s4 + $0x2] ss:$0 sm:$0xff]  ;;  %v280_v30 = vld [vmem:[%s557_s4 + $0x3] ss:$0 sm:$0xff] }
  0x4c   :  { %289 = vmatprep.subr.bf16.mxu0 %v425_v0  ;;  %297 = vmatprep.subr.bf16.mxu1 %v425_v0 }
  0x4f   :  { %290 = vmatpush3.bf16.msra.mxu0 %v313_v3  ;;  %298 = vmatpush3.bf16.msra.mxu1 %v314_v4 }
  0x52   :  { %292 = vmatmul.mubr.msk.bf16.vlgmr.msra.gmra.mrb[0].mxu0 %vm105_vm1, %v315_v5  ;;  %300 = vmatmul.mubr.msk.bf16.vlgmr.msra.gmra.mrb[0].mxu1 %vm105_vm1, %v316_v6 }
 0x125   :  { %v143_v7 = vpop.f32.mrb[0].mxu0  ;;  %v204_v8 = vpop.f32.mrb[0].mxu1 }
 0x126   :  { %v293_v10 = vpop.f32.mrb[1].mxu0  ;;  %v205_v11 = vadd.f32 %v204_v8, %v143_v7  ;;  %v301_v12 = vpop.f32.mrb[1].mxu1 }
 0x127   :  { %v146_v13 = vpop.f32.mrb[2].mxu0  ;;  %v207_v15 = vpop.f32.mrb[2].mxu1 }
 0x128   :  { %v294_v16 = vpop.f32.mrb[3].mxu0  ;;  %v219_v17 = vadd.f32 %v277_v9, %v205_v11  ;;  %v208_v18 = vadd.f32 %v207_v15, %v146_v13  ;;  %v302_v19 = vpop.f32.mrb[3].mxu1 }
 0x12a   :  { %v227_v20 = vmul.f32 %v278_v14, %v219_v17  ;;  %v220_v21 = vadd.f32 %v277_v9, %v208_v18  ;;  %vm221_vm2 = vcmp.ge.f32.partialorder %v219_v17, 0.0 }
 0x12c   :  { %v228_v23 = vmul.f32 %v278_v14, %v220_v21  ;;  %v229_v24 = vsel %vm221_vm2, %v219_v17, %v227_v20  ;;  %vm222_vm3 = vcmp.ge.f32.partialorder %v220_v21, 0.0 }
 0x12d   :  { %v235_v25 = vmul.f32 %v279_v22, %v229_v24 }
 0x12e   :  { %v230_v26 = vsel %vm222_vm3, %v220_v21, %v228_v23 }
 0x12f   :  { %v237_v27 = vsel %vm105_vm1, %v235_v25, 0.0  ;;  %v236_v28 = vmul.f32 %v279_v22, %v230_v26 }
 0x130   :  { %238 = vadd.xlane.f32.xlu0 %v237_v27 }
 0x131   :  { %v240_v29 = vsel %vm105_vm1, %v236_v28, 0.0 }
 0x134   :  { %241 = vadd.xlane.f32.xlu0 %v240_v29 }
 0x1bd   :  { %v239_v31 = vpop.xlane.xlu0 %238 }
 0x1be   :  { %v247_v32 = vadd.f32 %v280_v30, %v239_v31 }
 0x1c0   :  { %v249_v33 = vsub.f32 0.0, %v247_v32 }
 0x1c1   :  { %v242_v34 = vpop.xlane.xlu0 %241 }
 0x1c2   :  { %v251_v35 = vmul.f32 1.442695, %v249_v33  ;;  %v248_v36 = vadd.f32 %v280_v30, %v242_v34 }
 0x1c4   :  { %317 = vpow2.f32 %v251_v35  ;;  %v250_v37 = vsub.f32 0.0, %v248_v36 }
 0x1c6   :  { %v253_v38 = vmul.f32 1.442695, %v250_v37 }
 0x1c8   :  { %319 = vpow2.f32 %v253_v38 }
 0x1ce   :  { %v318_v39 = vpop.eup %317 }
 0x1cf   :  { %v255_v40 = vadd.f32 1.0, %v318_v39 }
 0x1d1   :  { %321 = vrcp.f32 %v255_v40 }
 0x1d2   :  { %v320_v41 = vpop.eup %319 }
 0x1d3   :  { %v256_v42 = vadd.f32 1.0, %v320_v41 }
 0x1d5   :  { %323 = vrcp.f32 %v256_v42 }
 0x1db   :  { %v322_v43 = vpop.eup %321 }
 0x1dc   :  { %260 = vst.msk [vmem:[%s558_s5] sm:$0xff] %vm259_vm4, %v322_v43 }
 0x1df   :  { %v324_v44 = vpop.eup %323 }
 0x1e0   :  { %261 = vst.msk [vmem:[%s558_s5 + $0x8] sm:$0xff] %vm259_vm4, %v324_v44 }
 0x1e1   :  { %266 = vsyncpa [#allocation3], 1 }
 0x1e2   :  { %267 = vsyncpa [#allocation5], 1 }
 0x1e3   :  { %268 = vsyncpa [#allocation8], 1 }

</bundles_post_ra>
